<compile_context>
chip_gen: v7x
topology: tpu7x:2x2x1
jax: 0.10.0
libtpu: 0.0.40
codegen_flags: <defaults>
</compile_context>

<pallas_src>
import jax
import jax.numpy as jnp
from jax.experimental import pallas as pl
from jax.experimental.pallas import tpu as pltpu

LANE = 128


def _round_up(x, m):
    return ((x + m - 1) // m) * m


def _ae_kernel(x_ref,
               w1_ref, b1_ref,   # encoder layer 1: (Dp, Hp), (1, Hp)
               w2_ref, b2_ref,   # encoder layer 2: (Hp, Zp), (1, Zp)
               w3_ref, b3_ref,   # decoder layer 1: (Zp, Hp), (1, Hp)
               w4_ref, b4_ref,   # decoder layer 2: (Hp, Dp), (1, Dp)
               out_ref):
    x = x_ref[...]                                          # (TB, Dp) bf16

    # ---- encoder ----
    h1 = jnp.dot(x, w1_ref[...],
                 preferred_element_type=jnp.float32) + b1_ref[...]
    h1 = jnp.maximum(h1, 0.0)                               # ReLU (f32, VPU)
    z = jnp.dot(h1.astype(w2_ref.dtype), w2_ref[...],
                preferred_element_type=jnp.float32) + b2_ref[...]

    # ---- decoder ----
    h2 = jnp.dot(z.astype(w3_ref.dtype), w3_ref[...],
                 preferred_element_type=jnp.float32) + b3_ref[...]
    h2 = jnp.maximum(h2, 0.0)                               # ReLU (f32, VPU)
    y = jnp.dot(h2.astype(w4_ref.dtype), w4_ref[...],
                preferred_element_type=jnp.float32) + b4_ref[...]

    # Sigmoid: exp and approximate reciprocal both land on the EUP slot.
    out_ref[...] = pl.reciprocal(1.0 + jnp.exp(-y), approx=True)


def prepare_params(params, compute_dtype=jnp.bfloat16):
    """Zero-pad all feature dims to multiples of 128 and cast weights.

    Padding is numerically exact: padded input columns are zero, padded
    weight rows multiply zeros, padded bias entries are zero.
    """
    w1, b1, w2, b2, w3, b3, w4, b4 = params
    D, H = w1.shape
    Z = w2.shape[1]
    Dp, Hp, Zp = _round_up(D, LANE), _round_up(H, LANE), _round_up(Z, LANE)

    def pad2(a, r, c):
        return jnp.pad(a, ((0, r - a.shape[0]), (0, c - a.shape[1])))

    w1p = pad2(w1, Dp, Hp).astype(compute_dtype)
    b1p = pad2(b1, 1, Hp).astype(jnp.float32)
    w2p = pad2(w2, Hp, Zp).astype(compute_dtype)
    b2p = pad2(b2, 1, Zp).astype(jnp.float32)
    w3p = pad2(w3, Zp, Hp).astype(compute_dtype)
    b3p = pad2(b3, 1, Hp).astype(jnp.float32)
    w4p = pad2(w4, Hp, Dp).astype(compute_dtype)
    b4p = pad2(b4, 1, Dp).astype(jnp.float32)
    return (w1p, b1p, w2p, b2p, w3p, b3p, w4p, b4p)


@jax.jit
def vanilla_ae_forward(x_nchw, padded_params):
    """Run the fused AE forward. x_nchw: (B, C, H, W) float32."""
    B, C, H_img, W_img = x_nchw.shape
    D = C * H_img * W_img

    w1p, b1p, w2p, b2p, w3p, b3p, w4p, b4p = padded_params
    Dp, Hp = w1p.shape
    Zp = w2p.shape[1]
    compute_dtype = w1p.dtype

    # Batch tile: small batches only round up to the 8-row sublane granule
    # (no wasted MXU work); large batches stream in 512-row tiles so the
    # double-buffered (x bf16 + out f32) traffic stays a few MiB of VMEM.
    if B <= 512:
        TB = max(8, _round_up(B, 8))
    else:
        TB = 512
    B_pad = _round_up(B, TB)

    x2d = x_nchw.reshape(B, D).astype(compute_dtype)
    x2d = jnp.pad(x2d, ((0, B_pad - B), (0, Dp - D)))

    stream = lambda i: (i, 0)      # activations: one block per grid step
    resident = lambda i: (0, 0)    # weights/biases: same block every step

    out2d = pl.pallas_call(
        _ae_kernel,
        out_shape=jax.ShapeDtypeStruct((B_pad, Dp), jnp.float32),
        grid=(B_pad // TB,),
        in_specs=[
            pl.BlockSpec((TB, Dp), stream),
            pl.BlockSpec((Dp, Hp), resident), pl.BlockSpec((1, Hp), resident),
            pl.BlockSpec((Hp, Zp), resident), pl.BlockSpec((1, Zp), resident),
            pl.BlockSpec((Zp, Hp), resident), pl.BlockSpec((1, Hp), resident),
            pl.BlockSpec((Hp, Dp), resident), pl.BlockSpec((1, Dp), resident),
        ],
        out_specs=pl.BlockSpec((TB, Dp), stream),
        compiler_params=pltpu.CompilerParams(
            dimension_semantics=("parallel",)),
    )(x2d, w1p, b1p, w2p, b2p, w3p, b3p, w4p, b4p)

    # Drop batch / feature padding and restore NCHW.
    return out2d[:B, :D].reshape(B, C, H_img, W_img)


def init_params(key, d_in, hidden, latent):
    """Deterministic (seeded) parameter init mirroring nn.Linear shapes."""
    ks = jax.random.split(key, 8)

    def lin(kw, kb, fan_in, fan_out):
        bound = 1.0 / jnp.sqrt(jnp.float32(fan_in))
        w = jax.random.uniform(kw, (fan_in, fan_out), jnp.float32, -bound, bound)
        b = jax.random.uniform(kb, (1, fan_out), jnp.float32, -bound, bound)
        return w, b

    w1, b1 = lin(ks[0], ks[1], d_in, hidden)     # encoder Linear(D, H)
    w2, b2 = lin(ks[2], ks[3], hidden, latent)   # encoder Linear(H, Z)
    w3, b3 = lin(ks[4], ks[5], latent, hidden)   # decoder Linear(Z, H)
    w4, b4 = lin(ks[6], ks[7], hidden, d_in)     # decoder Linear(H, D)
    return (w1, b1, w2, b2, w3, b3, w4, b4)


def _reference_forward(x_nchw, params):
    """Pure-JAX f32 reference for a sanity check."""
    B = x_nchw.shape[0]
    x = x_nchw.reshape(B, -1)
    w1, b1, w2, b2, w3, b3, w4, b4 = params
    h1 = jnp.maximum(x @ w1 + b1, 0.0)
    z = h1 @ w2 + b2
    h2 = jnp.maximum(z @ w3 + b3, 0.0)
    y = h2 @ w4 + b4
    return jax.nn.sigmoid(y).reshape(x_nchw.shape)


if __name__ == "__main__":
    key = jax.random.PRNGKey(0)
    k_x, k_p = jax.random.split(key)

    # Small NCHW input consistent with an image auto-encoder.
    B, C, H, W = 2, 4, 16, 16
    D = C * H * W          # 1024
    HIDDEN = 128
    LATENT = 32            # padded to 128 lanes inside prepare_params

    x = jax.random.normal(k_x, (B, C, H, W), dtype=jnp.float32)
    params = init_params(k_p, D, HIDDEN, LATENT)
    padded_params = prepare_params(params, compute_dtype=jnp.bfloat16)

    out = vanilla_ae_forward(x, padded_params)
    out = jax.block_until_ready(out)

    ref = _reference_forward(x, params)
    assert out.shape == x.shape
    # bf16 MXU inputs + approximate reciprocal => relaxed tolerance vs f32 ref.
    assert jnp.allclose(out, ref, atol=2e-2, rtol=2e-2), (
        float(jnp.max(jnp.abs(out - ref))))

    print("KERNEL_OK")
</pallas_src>

<mosaic_0001>
module attributes {stable_mosaic.version = 11 : i64} {
  func.func @_ae_kernel(%arg0: i32, %arg1: memref<8x1024xbf16, #tpu.memory_space<vmem>>, %arg2: memref<1024x128xbf16, #tpu.memory_space<vmem>>, %arg3: memref<1x128xf32, #tpu.memory_space<vmem>>, %arg4: memref<128x128xbf16, #tpu.memory_space<vmem>>, %arg5: memref<1x128xf32, #tpu.memory_space<vmem>>, %arg6: memref<128x128xbf16, #tpu.memory_space<vmem>>, %arg7: memref<1x128xf32, #tpu.memory_space<vmem>>, %arg8: memref<128x1024xbf16, #tpu.memory_space<vmem>>, %arg9: memref<1x1024xf32, #tpu.memory_space<vmem>>, %arg10: memref<8x1024xf32, #tpu.memory_space<vmem>>) attributes {dimension_semantics = [#tpu.dimension_semantics<parallel>], iteration_bounds = array<i64: 1>, scalar_prefetch = 0 : i64, scratch_operands = 0 : i64, tpu.core_type = #tpu.core_type<tc>, window_params = [{transform_indices = @transform_0, window_bounds = array<i64: 8, 1024>}, {pipeline_mode = #tpu.pipeline_mode<synchronous>, transform_indices = @transform_1, window_bounds = array<i64: 1024, 128>}, {pipeline_mode = #tpu.pipeline_mode<synchronous>, transform_indices = @transform_2, window_bounds = array<i64: 1, 128>}, {pipeline_mode = #tpu.pipeline_mode<synchronous>, transform_indices = @transform_3, window_bounds = array<i64: 128, 128>}, {pipeline_mode = #tpu.pipeline_mode<synchronous>, transform_indices = @transform_4, window_bounds = array<i64: 1, 128>}, {pipeline_mode = #tpu.pipeline_mode<synchronous>, transform_indices = @transform_5, window_bounds = array<i64: 128, 128>}, {pipeline_mode = #tpu.pipeline_mode<synchronous>, transform_indices = @transform_6, window_bounds = array<i64: 1, 128>}, {pipeline_mode = #tpu.pipeline_mode<synchronous>, transform_indices = @transform_7, window_bounds = array<i64: 128, 1024>}, {pipeline_mode = #tpu.pipeline_mode<synchronous>, transform_indices = @transform_8, window_bounds = array<i64: 1, 1024>}, {transform_indices = @transform_9, window_bounds = array<i64: 8, 1024>}]} {
    %c0 = arith.constant 0 : index
    %c0_0 = arith.constant 0 : index
    %0 = vector.load %arg1[%c0, %c0_0] : memref<8x1024xbf16, #tpu.memory_space<vmem>>, vector<8x1024xbf16>
    %c0_1 = arith.constant 0 : index
    %c0_2 = arith.constant 0 : index
    %1 = vector.load %arg2[%c0_1, %c0_2] : memref<1024x128xbf16, #tpu.memory_space<vmem>>, vector<1024x128xbf16>
    %cst = arith.constant dense<0.000000e+00> : vector<8x128xf32>
    %2 = tpu.matmul %0, %1, %cst {dimension_numbers = #tpu.dot_dimension_numbers<[1], [0], [0], [1], [0, 0, 1, 1], [], []>} : vector<8x1024xbf16>, vector<1024x128xbf16>, vector<8x128xf32> -> vector<8x128xf32>
    %c0_3 = arith.constant 0 : index
    %c0_4 = arith.constant 0 : index
    %3 = vector.load %arg3[%c0_3, %c0_4] : memref<1x128xf32, #tpu.memory_space<vmem>>, vector<1x128xf32>
    %4 = vector.broadcast %3 : vector<1x128xf32> to vector<8x128xf32>
    %5 = arith.addf %2, %4 : vector<8x128xf32>
    %cst_5 = arith.constant 0.000000e+00 : f32
    %6 = vector.broadcast %cst_5 : f32 to vector<8x128xf32>
    %7 = arith.maximumf %5, %6 : vector<8x128xf32>
    %8 = arith.truncf %7 : vector<8x128xf32> to vector<8x128xbf16>
    %c0_6 = arith.constant 0 : index
    %c0_7 = arith.constant 0 : index
    %9 = vector.load %arg4[%c0_6, %c0_7] : memref<128x128xbf16, #tpu.memory_space<vmem>>, vector<128x128xbf16>
    %cst_8 = arith.constant dense<0.000000e+00> : vector<8x128xf32>
    %10 = tpu.matmul %8, %9, %cst_8 {dimension_numbers = #tpu.dot_dimension_numbers<[1], [0], [0], [1], [0, 0, 1, 1], [], []>} : vector<8x128xbf16>, vector<128x128xbf16>, vector<8x128xf32> -> vector<8x128xf32>
    %c0_9 = arith.constant 0 : index
    %c0_10 = arith.constant 0 : index
    %11 = vector.load %arg5[%c0_9, %c0_10] : memref<1x128xf32, #tpu.memory_space<vmem>>, vector<1x128xf32>
    %12 = vector.broadcast %11 : vector<1x128xf32> to vector<8x128xf32>
    %13 = arith.addf %10, %12 : vector<8x128xf32>
    %14 = arith.truncf %13 : vector<8x128xf32> to vector<8x128xbf16>
    %c0_11 = arith.constant 0 : index
    %c0_12 = arith.constant 0 : index
    %15 = vector.load %arg6[%c0_11, %c0_12] : memref<128x128xbf16, #tpu.memory_space<vmem>>, vector<128x128xbf16>
    %cst_13 = arith.constant dense<0.000000e+00> : vector<8x128xf32>
    %16 = tpu.matmul %14, %15, %cst_13 {dimension_numbers = #tpu.dot_dimension_numbers<[1], [0], [0], [1], [0, 0, 1, 1], [], []>} : vector<8x128xbf16>, vector<128x128xbf16>, vector<8x128xf32> -> vector<8x128xf32>
    %c0_14 = arith.constant 0 : index
    %c0_15 = arith.constant 0 : index
    %17 = vector.load %arg7[%c0_14, %c0_15] : memref<1x128xf32, #tpu.memory_space<vmem>>, vector<1x128xf32>
    %18 = vector.broadcast %17 : vector<1x128xf32> to vector<8x128xf32>
    %19 = arith.addf %16, %18 : vector<8x128xf32>
    %cst_16 = arith.constant 0.000000e+00 : f32
    %20 = vector.broadcast %cst_16 : f32 to vector<8x128xf32>
    %21 = arith.maximumf %19, %20 : vector<8x128xf32>
    %22 = arith.truncf %21 : vector<8x128xf32> to vector<8x128xbf16>
    %c0_17 = arith.constant 0 : index
    %c0_18 = arith.constant 0 : index
    %23 = vector.load %arg8[%c0_17, %c0_18] : memref<128x1024xbf16, #tpu.memory_space<vmem>>, vector<128x1024xbf16>
    %cst_19 = arith.constant dense<0.000000e+00> : vector<8x1024xf32>
    %24 = tpu.matmul %22, %23, %cst_19 {dimension_numbers = #tpu.dot_dimension_numbers<[1], [0], [0], [1], [0, 0, 1, 1], [], []>} : vector<8x128xbf16>, vector<128x1024xbf16>, vector<8x1024xf32> -> vector<8x1024xf32>
    %c0_20 = arith.constant 0 : index
    %c0_21 = arith.constant 0 : index
    %25 = vector.load %arg9[%c0_20, %c0_21] : memref<1x1024xf32, #tpu.memory_space<vmem>>, vector<1x1024xf32>
    %26 = vector.broadcast %25 : vector<1x1024xf32> to vector<8x1024xf32>
    %27 = arith.addf %24, %26 : vector<8x1024xf32>
    %cst_22 = arith.constant 0.000000e+00 : f32
    %28 = vector.broadcast %cst_22 : f32 to vector<8x1024xf32>
    %29 = arith.subf %28, %27 : vector<8x1024xf32>
    %30 = math.exp %29 : vector<8x1024xf32>
    %cst_23 = arith.constant 1.000000e+00 : f32
    %31 = vector.broadcast %cst_23 : f32 to vector<8x1024xf32>
    %32 = arith.addf %31, %30 : vector<8x1024xf32>
    %33 = tpu.reciprocal %32 {approx = true} : vector<8x1024xf32> -> vector<8x1024xf32>
    %c0_24 = arith.constant 0 : index
    %c0_25 = arith.constant 0 : index
    %34 = vector.load %arg10[%c0_24, %c0_25] : memref<8x1024xf32, #tpu.memory_space<vmem>>, vector<8x1024xf32>
    tpu.vector_store %arg10[%c0_24, %c0_25], %33 {strides = array<i32>} : memref<8x1024xf32, #tpu.memory_space<vmem>>, vector<8x1024xf32>,
    return
  }
  func.func @transform_0(%arg0: i32) -> (i32, i32) {
    %c0_i32 = arith.constant 0 : i32
    %c0_i32_0 = arith.constant 0 : i32
    return %arg0, %c0_i32 : i32, i32
  }
  func.func @transform_1(%arg0: i32) -> (i32, i32) {
    %c0_i32 = arith.constant 0 : i32
    %c0_i32_0 = arith.constant 0 : i32
    %c0_i32_1 = arith.constant 0 : i32
    return %c0_i32, %c0_i32_0 : i32, i32
  }
  func.func @transform_2(%arg0: i32) -> (i32, i32) {
    %c0_i32 = arith.constant 0 : i32
    %c0_i32_0 = arith.constant 0 : i32
    %c0_i32_1 = arith.constant 0 : i32
    return %c0_i32, %c0_i32_0 : i32, i32
  }
  func.func @transform_3(%arg0: i32) -> (i32, i32) {
    %c0_i32 = arith.constant 0 : i32
    %c0_i32_0 = arith.constant 0 : i32
    %c0_i32_1 = arith.constant 0 : i32
    return %c0_i32, %c0_i32_0 : i32, i32
  }
  func.func @transform_4(%arg0: i32) -> (i32, i32) {
    %c0_i32 = arith.constant 0 : i32
    %c0_i32_0 = arith.constant 0 : i32
    %c0_i32_1 = arith.constant 0 : i32
    return %c0_i32, %c0_i32_0 : i32, i32
  }
  func.func @transform_5(%arg0: i32) -> (i32, i32) {
    %c0_i32 = arith.constant 0 : i32
    %c0_i32_0 = arith.constant 0 : i32
    %c0_i32_1 = arith.constant 0 : i32
    return %c0_i32, %c0_i32_0 : i32, i32
  }
  func.func @transform_6(%arg0: i32) -> (i32, i32) {
    %c0_i32 = arith.constant 0 : i32
    %c0_i32_0 = arith.constant 0 : i32
    %c0_i32_1 = arith.constant 0 : i32
    return %c0_i32, %c0_i32_0 : i32, i32
  }
  func.func @transform_7(%arg0: i32) -> (i32, i32) {
    %c0_i32 = arith.constant 0 : i32
    %c0_i32_0 = arith.constant 0 : i32
    %c0_i32_1 = arith.constant 0 : i32
    return %c0_i32, %c0_i32_0 : i32, i32
  }
  func.func @transform_8(%arg0: i32) -> (i32, i32) {
    %c0_i32 = arith.constant 0 : i32
    %c0_i32_0 = arith.constant 0 : i32
    %c0_i32_1 = arith.constant 0 : i32
    return %c0_i32, %c0_i32_0 : i32, i32
  }
  func.func @transform_9(%arg0: i32) -> (i32, i32) {
    %c0_i32 = arith.constant 0 : i32
    %c0_i32_0 = arith.constant 0 : i32
    return %arg0, %c0_i32 : i32, i32
  }
}

</mosaic_0001>

<bundles_post_ra>
// kernel: vanilla_ae_forward.1
= control target key start
LH: loop header
LB: loop body
LE: loop exit
PB: predicated region body
PF: predicated region fallthrough
CT: control target
= control target key end

     0   :  { %14 = vsyncpa [#allocation3], 0  ;;  %s2306_s0 = inlined_call_operand.vmem [shape: bf16[8,1024], index: 0, kind: input, shape index: {}]   ;;  %s2307_s1 = inlined_call_operand.hbm [shape: bf16[1024,128], index: 1, kind: input, shape index: {}]   ;;  %s2308_s2 = inlined_call_operand.vmem [shape: f32[1,128], index: 2, kind: input, shape index: {}]   ;;  %s2309_s3 = inlined_call_operand.vmem [shape: bf16[128,128], index: 3, kind: input, shape index: {}]   ;;  %s2310_s4 = inlined_call_operand.vmem [shape: f32[1,128], index: 4, kind: input, shape index: {}]   ;;  %s2311_s5 = inlined_call_operand.vmem [shape: bf16[128,128], index: 5, kind: input, shape index: {}]   ;;  %s2312_s6 = inlined_call_operand.vmem [shape: f32[1,128], index: 6, kind: input, shape index: {}]   ;;  %s2313_s7 = inlined_call_operand.hbm [shape: bf16[128,1024], index: 7, kind: input, shape index: {}]   ;;  %s2314_s8 = inlined_call_operand.vmem [shape: f32[1,1024], index: 8, kind: input, shape index: {}]   ;;  %s2315_s9 = inlined_call_operand.vmem [shape: f32[8,1024], index: 9, kind: output, shape index: {}]  }
   0x1   :  { %15 = vsyncpa [#allocation5], 0  ;;  %s2121_s30 = smov [#allocation2]   ;;  %s2073_s13 = scalar_lea.hbm %s2307_s1, 8192 }
   0x2   :  { %s23_s10 = sshll.u32 %s2121_s30, 4  ;;  %p2074_p0 = scmp.ne.s32.totalorder %s2307_s1, %s2073_s13  ;;  %s24_s10 = int_to_ptr.vmem [resolvable:$true] %s23_s10 }
   0x3   :  { %p2077_p1 = scmp.lt.u32.totalorder %s2073_s13, %s2307_s1 }
   0x5   :  { %p2079_p2 = pnand %p2077_p1, %p2074_p0 }
   0x7   :  { %2082 = shalt.err (!%p2079_p2)
}
   0x8   :  { %s2083_s18 = scalar_lea.vmem %s24_s10, 8192  ;;  %p2088_p4 = scmp.lt.s32.totalorder %s24_s10, %s24_s10 }
   0x9   :  { %p2084_p3 = scmp.ne.s32.totalorder %s24_s10, %s2083_s18  ;;  %p2089_p5 = scmp.lt.s32.totalorder %s2083_s18, %s2083_s18 }
   0xb   :  { %p2090_p6 = por %p2089_p5, %p2088_p4 }
   0xd   :  { %p2091_p7 = pnand %p2090_p6, %p2084_p3 }
   0xf   :  { %2094 = shalt.err (!%p2091_p7)
}
  0x10   :  { %s2122_s19 = smov 64   ;;  %s2123_s20 = smov 4  }
  0x11   :  { %29 = dma.hbm_to_vmem [thread:$0]  %s2307_s1, 8192, %s24_s10, [#allocation3], %s2122_s19, %s2122_s19, %s2123_s20  }
  0x12   :  { %s2124_s23 = smov [#allocation4]   ;;  %s2095_s27 = scalar_lea.hbm %s2313_s7, 8192 }
  0x13   :  { %s45_s24 = sshll.u32 %s2124_s23, 4  ;;  %p2096_p8 = scmp.ne.s32.totalorder %s2313_s7, %s2095_s27  ;;  %s46_s24 = int_to_ptr.vmem [resolvable:$true] %s45_s24 }
  0x14   :  { %p2099_p9 = scmp.lt.u32.totalorder %s2095_s27, %s2313_s7 }
  0x16   :  { %p2101_p10 = pnand %p2099_p9, %p2096_p8 }
  0x18   :  { %2104 = shalt.err (!%p2101_p10)
}
  0x19   :  { %s2105_s12 = scalar_lea.vmem %s46_s24, 8192  ;;  %p2110_p12 = scmp.lt.s32.totalorder %s46_s24, %s46_s24 }
  0x1a   :  { %p2106_p11 = scmp.ne.s32.totalorder %s46_s24, %s2105_s12  ;;  %p2111_p13 = scmp.lt.s32.totalorder %s2105_s12, %s2105_s12 }
  0x1c   :  { %p2112_p0 = por %p2111_p13, %p2110_p12 }
  0x1e   :  { %p2113_p1 = pnand %p2112_p0, %p2106_p11 }
  0x20   :  { %2116 = shalt.err (!%p2113_p1)
}
  0x21   :  { %s2125_s1 = smov 512   ;;  %s2126_s10 = smov 32  }
  0x22   :  { %51 = dma.hbm_to_vmem [thread:$0]  %s2313_s7, 8192, %s46_s24, [#allocation5], %s2125_s1, %s2125_s1, %s2126_s10  }
  0x23   :  { %2117 = dma.done.wait [#allocation3], 8192  }
  0x24   :  { %2118 = vsyncadd [#allocation3], 4294959104 }
  0x25   :  { %2119 = dma.done.wait [#allocation5], 8192  }
  0x26   :  { %2120 = vsyncadd [#allocation5], 4294959104  ;;  %v1953_v0 = vld [vmem:[#allocation2 + $0x40] sm:$0xff]   ;;  %v1957_v4 = vld [vmem:[#allocation2 + $0x48] sm:$0xff]   ;;  %vm2128_vm0 = vmmov 0  }
  0x27   :  { %v1954_v1 = vld [vmem:[#allocation2 + $0xc0] sm:$0xff]   ;;  %1798 = vmatprep.subr.bf16.mxu0 %v1953_v0  ;;  %v1958_v5 = vld [vmem:[#allocation2 + $0xc8] sm:$0xff]   ;;  %v1961_v8 = vld [vmem:[#allocation2 + $0x50] sm:$0xff]  }
  0x28   :  { %v1955_v2 = vld [vmem:[#allocation2] sm:$0xff]   ;;  %1820 = vmatprep.subr.bf16.mxu1 %v1954_v1  ;;  %v1959_v6 = vld [vmem:[#allocation2 + $0x8] sm:$0xff]   ;;  %v1962_v9 = vld [vmem:[#allocation2 + $0xd0] sm:$0xff]  }
  0x29   :  { %v1956_v3 = vld [vmem:[#allocation2 + $0x80] sm:$0xff]   ;;  %1799 = vmatpush3.bf16.msra.mxu0 %v1955_v2  ;;  %v1960_v7 = vld [vmem:[#allocation2 + $0x88] sm:$0xff]   ;;  %v1963_v10 = vld [vmem:[#allocation2 + $0x10] sm:$0xff]  }
  0x2a   :  { %1821 = vmatpush3.bf16.msra.mxu1 %v1956_v3  ;;  %1800 = vmatprep.subr.bf16.mxu0 %v1957_v4  ;;  %v1964_v11 = vld [vmem:[#allocation2 + $0x90] sm:$0xff]   ;;  %v1965_v12 = vld [vmem:[#allocation2 + $0x58] sm:$0xff]   ;;  %v1969_v16 = vld [vmem:[#allocation2 + $0x60] sm:$0xff]  }
  0x2b   :  { %1822 = vmatprep.subr.bf16.mxu1 %v1958_v5  ;;  %v1966_v13 = vld [vmem:[#allocation2 + $0xd8] sm:$0xff]   ;;  %v1970_v17 = vld [vmem:[#allocation2 + $0xe0] sm:$0xff]   ;;  %v1973_v20 = vld [vmem:[#allocation2 + $0x68] sm:$0xff]  }
  0x2c   :  { %v1967_v14 = vld [vmem:[#allocation2 + $0x18] sm:$0xff]   ;;  %v1971_v18 = vld [vmem:[#allocation2 + $0x20] sm:$0xff]   ;;  %v1974_v21 = vld [vmem:[#allocation2 + $0xe8] sm:$0xff]  }
  0x2d   :  { %1801 = vmatpush3.bf16.msra.mxu0 %v1959_v6  ;;  %v1968_v15 = vld [vmem:[#allocation2 + $0x98] sm:$0xff]   ;;  %v1972_v19 = vld [vmem:[#allocation2 + $0xa0] sm:$0xff]   ;;  %v1975_v22 = vld [vmem:[#allocation2 + $0x28] sm:$0xff]  }
  0x2e   :  { %1823 = vmatpush3.bf16.msra.mxu1 %v1960_v7  ;;  %1802 = vmatprep.subr.bf16.mxu0 %v1961_v8  ;;  %v1976_v23 = vld [vmem:[#allocation2 + $0xa8] sm:$0xff]   ;;  %v1977_v24 = vld [vmem:[#allocation2 + $0x70] sm:$0xff]   ;;  %v1981_v28 = vld [vmem:[#allocation2 + $0x78] sm:$0xff]  }
  0x2f   :  { %1824 = vmatprep.subr.bf16.mxu1 %v1962_v9  ;;  %v1978_v25 = vld [vmem:[#allocation2 + $0xf0] sm:$0xff]   ;;  %v1982_v29 = vld [vmem:[#allocation2 + $0xf8] sm:$0xff]   ;;  %v61_v32 = vld [vmem:[%s2306_s0] sm:$0xff] }
  0x30   :  { %v1979_v26 = vld [vmem:[#allocation2 + $0x30] sm:$0xff]   ;;  %v1983_v30 = vld [vmem:[#allocation2 + $0x38] sm:$0xff]   ;;  %v62_v33 = vld [vmem:[%s2306_s0 + $0x8] sm:$0xff]  ;;  %v1644_v34 = vcombine.low %v61_v32, %v61_v32  ;;  %v1645_v35 = vcombine.high %v61_v32, %v61_v32 }
  0x31   :  { %1803 = vmatpush3.bf16.msra.mxu0 %v1963_v10  ;;  %v1980_v27 = vld [vmem:[#allocation2 + $0xb0] sm:$0xff]   ;;  %v1984_v31 = vld [vmem:[#allocation2 + $0xb8] sm:$0xff]   ;;  %v1646_v36 = vcombine.low %v62_v33, %v62_v33  ;;  %v1647_v37 = vcombine.high %v62_v33, %v62_v33  ;;  %v1989_v38 = vld [vmem:[#allocation2 + $0x140] sm:$0xff]  }
  0x32   :  { %1825 = vmatpush3.bf16.msra.mxu1 %v1964_v11  ;;  %1804 = vmatprep.subr.bf16.mxu0 %v1965_v12  ;;  %v1990_v39 = vld [vmem:[#allocation2 + $0x1c0] sm:$0xff]   ;;  %v1993_v42 = vld [vmem:[#allocation2 + $0x148] sm:$0xff]   ;;  %v1997_v46 = vld [vmem:[#allocation2 + $0x150] sm:$0xff]  }
  0x33   :  { %1826 = vmatprep.subr.bf16.mxu1 %v1966_v13  ;;  %644 = vmatprep.mubr.bf16.mxu0 %v1645_v35  ;;  %v1991_v40 = vld [vmem:[#allocation2 + $0x100] sm:$0xff]   ;;  %v1994_v43 = vld [vmem:[#allocation2 + $0x1c8] sm:$0xff]   ;;  %v1998_v47 = vld [vmem:[#allocation2 + $0x1d0] sm:$0xff]   ;;  %v2127_v13 = vmov 0.0  }
  0x34   :  { %684 = vmatprep.mubr.bf16.mxu1 %v1647_v37  ;;  %v1992_v41 = vld [vmem:[#allocation2 + $0x180] sm:$0xff]   ;;  %v1995_v44 = vld [vmem:[#allocation2 + $0x108] sm:$0xff]   ;;  %v1999_v48 = vld [vmem:[#allocation2 + $0x110] sm:$0xff]  }
  0x35   :  { %1805 = vmatpush3.bf16.msra.mxu0 %v1967_v14  ;;  %v1996_v45 = vld [vmem:[#allocation2 + $0x188] sm:$0xff]   ;;  %v2000_v49 = vld [vmem:[#allocation2 + $0x190] sm:$0xff]   ;;  %v2001_v50 = vld [vmem:[#allocation2 + $0x158] sm:$0xff]  }
  0x36   :  { %1827 = vmatpush3.bf16.msra.mxu1 %v1968_v15  ;;  %1806 = vmatprep.subr.bf16.mxu0 %v1969_v16  ;;  %v2002_v51 = vld [vmem:[#allocation2 + $0x1d8] sm:$0xff]   ;;  %v2005_v54 = vld [vmem:[#allocation2 + $0x160] sm:$0xff]   ;;  %v2009_v58 = vld [vmem:[#allocation2 + $0x168] sm:$0xff]  }
  0x37   :  { %1828 = vmatprep.subr.bf16.mxu1 %v1970_v17  ;;  %v2003_v52 = vld [vmem:[#allocation2 + $0x118] sm:$0xff]   ;;  %v2006_v55 = vld [vmem:[#allocation2 + $0x1e0] sm:$0xff]   ;;  %v2010_v59 = vld [vmem:[#allocation2 + $0x1e8] sm:$0xff]  }
  0x38   :  { %v2004_v53 = vld [vmem:[#allocation2 + $0x198] sm:$0xff]   ;;  %v2007_v56 = vld [vmem:[#allocation2 + $0x120] sm:$0xff]   ;;  %v2011_v60 = vld [vmem:[#allocation2 + $0x128] sm:$0xff]  }
  0x39   :  { %1807 = vmatpush3.bf16.msra.mxu0 %v1971_v18  ;;  %v2008_v57 = vld [vmem:[#allocation2 + $0x1a0] sm:$0xff]   ;;  %v2012_v61 = vld [vmem:[#allocation2 + $0x1a8] sm:$0xff]   ;;  %v2013_v62 = vld [vmem:[#allocation2 + $0x170] sm:$0xff]  }
  0x3a   :  { %1829 = vmatpush3.bf16.msra.mxu1 %v1972_v19  ;;  %1808 = vmatprep.subr.bf16.mxu0 %v1973_v20  ;;  %v2014_v63 = vld [vmem:[#allocation2 + $0x1f0] sm:$0xff]   ;;  %v2017_v2 = vld [vmem:[#allocation2 + $0x178] sm:$0xff]   ;;  %v2025_v12 = vld [vmem:[%s2309_s3] sm:$0xff]  }
  0x3b   :  { %1830 = vmatprep.subr.bf16.mxu1 %v1974_v21  ;;  %v2015_v0 = vld [vmem:[#allocation2 + $0x130] sm:$0xff]   ;;  %v2018_v3 = vld [vmem:[#allocation2 + $0x1f8] sm:$0xff]   ;;  %v2026_v14 = vld [vmem:[%s2309_s3 + $0x8] sm:$0xff]  }
  0x3c   :  { %v2016_v1 = vld [vmem:[#allocation2 + $0x1b0] sm:$0xff]   ;;  %v2019_v4 = vld [vmem:[#allocation2 + $0x138] sm:$0xff]   ;;  %v2029_v17 = vld [vmem:[%s2309_s3 + $0x20] sm:$0xff]  }
  0x3d   :  { %1809 = vmatpush3.bf16.msra.mxu0 %v1975_v22  ;;  %v2020_v5 = vld [vmem:[#allocation2 + $0x1b8] sm:$0xff]   ;;  %v63_v6 = vld [vmem:[%s2306_s0 + $0x10] sm:$0xff]  ;;  %v2030_v18 = vld [vmem:[%s2309_s3 + $0x28] sm:$0xff]  }
  0x3e   :  { %1831 = vmatpush3.bf16.msra.mxu1 %v1976_v23  ;;  %1810 = vmatprep.subr.bf16.mxu0 %v1977_v24  ;;  %v1648_v7 = vcombine.low %v63_v6, %v63_v6  ;;  %v1649_v8 = vcombine.high %v63_v6, %v63_v6  ;;  %v64_v9 = vld [vmem:[%s2306_s0 + $0x18] sm:$0xff]  ;;  %v2027_v15 = vld [vmem:[%s2309_s3 + $0x10] sm:$0xff]   ;;  %v2033_v21 = vld [vmem:[%s2311_s5] sm:$0xff]  }
  0x3f   :  { %1832 = vmatprep.subr.bf16.mxu1 %v1978_v25  ;;  %v1650_v10 = vcombine.low %v64_v9, %v64_v9  ;;  %v1651_v11 = vcombine.high %v64_v9, %v64_v9  ;;  %v2028_v16 = vld [vmem:[%s2309_s3 + $0x18] sm:$0xff]   ;;  %v2031_v19 = vld [vmem:[%s2309_s3 + $0x30] sm:$0xff]   ;;  %v2034_v22 = vld [vmem:[%s2311_s5 + $0x8] sm:$0xff]  }
  0x40   :  { %v2032_v20 = vld [vmem:[%s2309_s3 + $0x38] sm:$0xff]   ;;  %v2035_v23 = vld [vmem:[%s2311_s5 + $0x10] sm:$0xff]   ;;  %v2037_v25 = vld [vmem:[%s2311_s5 + $0x20] sm:$0xff]  }
  0x41   :  { %1811 = vmatpush3.bf16.msra.mxu0 %v1979_v26  ;;  %v2036_v24 = vld [vmem:[%s2311_s5 + $0x18] sm:$0xff]   ;;  %v2038_v26 = vld [vmem:[%s2311_s5 + $0x28] sm:$0xff]   ;;  %v1027_v9 = vld [vmem:[#allocation4 + $0xe0] sm:$0xff] }
  0x42   :  { %1833 = vmatpush3.bf16.msra.mxu1 %v1980_v27  ;;  %1812 = vmatprep.subr.bf16.mxu0 %v1981_v28  ;;  %v2039_v27 = vld [vmem:[%s2311_s5 + $0x30] sm:$0xff]  }
  0x43   :  { %1834 = vmatprep.subr.bf16.mxu1 %v1982_v29 }
  0x45   :  { %1813 = vmatpush3.bf16.msra.mxu0 %v1983_v30  ;;  %v1643_v30 = vld [vmem:[%s2308_s2] ss:$0 sm:$0xff] }
  0x46   :  { %1835 = vmatpush3.bf16.msra.mxu1 %v1984_v31  ;;  %1842 = vmatprep.subr.bf16.mxu0 %v1989_v38 }
  0x47   :  { %1864 = vmatprep.subr.bf16.mxu1 %v1990_v39 }
  0x48   :  { %645 = vmatmul.mubr.bf16.vlgmr.msra.gmra.mrb[0].mxu0 %v1644_v34 }
  0x49   :  { %685 = vmatmul.mubr.bf16.vlgmr.msra.gmra.mrb[0].mxu1 %v1646_v36  ;;  %1843 = vmatpush3.bf16.msra.mxu0 %v1991_v40 }
  0x4a   :  { %1865 = vmatpush3.bf16.msra.mxu1 %v1992_v41  ;;  %1844 = vmatprep.subr.bf16.mxu0 %v1993_v42 }
  0x4b   :  { %1866 = vmatprep.subr.bf16.mxu1 %v1994_v43  ;;  %724 = vmatprep.mubr.bf16.mxu0 %v1649_v8  ;;  %v1023_v8 = vld [vmem:[#allocation4 + $0xc0] sm:$0xff] }
  0x4c   :  { %764 = vmatprep.mubr.bf16.mxu1 %v1651_v11  ;;  %v1758_v11 = vcombine.low %v1023_v8, %v1027_v9 }
  0x4d   :  { %1845 = vmatpush3.bf16.msra.mxu0 %v1995_v44 }
  0x4e   :  { %1867 = vmatpush3.bf16.msra.mxu1 %v1996_v45  ;;  %1846 = vmatprep.subr.bf16.mxu0 %v1997_v46 }
  0x4f   :  { %1868 = vmatprep.subr.bf16.mxu1 %v1998_v47 }
  0x51   :  { %1847 = vmatpush3.bf16.msra.mxu0 %v1999_v48 }
  0x52   :  { %1869 = vmatpush3.bf16.msra.mxu1 %v2000_v49  ;;  %1848 = vmatprep.subr.bf16.mxu0 %v2001_v50 }
  0x53   :  { %1870 = vmatprep.subr.bf16.mxu1 %v2002_v51 }
  0x55   :  { %1849 = vmatpush3.bf16.msra.mxu0 %v2003_v52 }
  0x56   :  { %1871 = vmatpush3.bf16.msra.mxu1 %v2004_v53  ;;  %1850 = vmatprep.subr.bf16.mxu0 %v2005_v54 }
  0x57   :  { %1872 = vmatprep.subr.bf16.mxu1 %v2006_v55  ;;  %v2040_v55 = vld [vmem:[%s2311_s5 + $0x38] sm:$0xff]  }
  0x59   :  { %1851 = vmatpush3.bf16.msra.mxu0 %v2007_v56  ;;  %v999_v56 = vld [vmem:[#allocation4] sm:$0xff] }
  0x5a   :  { %1873 = vmatpush3.bf16.msra.mxu1 %v2008_v57  ;;  %1852 = vmatprep.subr.bf16.mxu0 %v2009_v58  ;;  %v1003_v57 = vld [vmem:[#allocation4 + $0x20] sm:$0xff]  ;;  %v1000_v58 = vld [vmem:[#allocation4 + $0x8] sm:$0xff] }
  0x5b   :  { %1874 = vmatprep.subr.bf16.mxu1 %v2010_v59  ;;  %v1734_v59 = vcombine.low %v999_v56, %v1003_v57 }
  0x5d   :  { %1853 = vmatpush3.bf16.msra.mxu0 %v2011_v60  ;;  %v1735_v60 = vcombine.high %v999_v56, %v1003_v57  ;;  %v1059_v56 = vld [vmem:[#allocation4 + $0x1e0] sm:$0xff]  ;;  %v1056_v57 = vld [vmem:[#allocation4 + $0x1c8] sm:$0xff] }
  0x5e   :  { %1875 = vmatpush3.bf16.msra.mxu1 %v2012_v61  ;;  %1854 = vmatprep.subr.bf16.mxu0 %v2013_v62  ;;  %v1004_v61 = vld [vmem:[#allocation4 + $0x28] sm:$0xff]  ;;  %v1007_v62 = vld [vmem:[#allocation4 + $0x40] sm:$0xff] }
  0x5f   :  { %1876 = vmatprep.subr.bf16.mxu1 %v2014_v63  ;;  %v1011_v63 = vld [vmem:[#allocation4 + $0x60] sm:$0xff] }
  0x61   :  { %1855 = vmatpush3.bf16.msra.mxu0 %v2015_v0  ;;  %v1736_v0 = vcombine.low %v1000_v58, %v1004_v61 }
  0x62   :  { %1877 = vmatpush3.bf16.msra.mxu1 %v2016_v1  ;;  %1856 = vmatprep.subr.bf16.mxu0 %v2017_v2  ;;  %v1737_v1 = vcombine.high %v1000_v58, %v1004_v61  ;;  %v1743_v2 = vcombine.high %v1007_v62, %v1011_v63 }
  0x63   :  { %1878 = vmatprep.subr.bf16.mxu1 %v2018_v3  ;;  %v1742_v3 = vcombine.low %v1007_v62, %v1011_v63  ;;  %v1001_v63 = vld [vmem:[#allocation4 + $0x10] sm:$0xff] }
  0x65   :  { %1857 = vmatpush3.bf16.msra.mxu0 %v2019_v4  ;;  %v1015_v4 = vld [vmem:[#allocation4 + $0x80] sm:$0xff] }
  0x66   :  { %1879 = vmatpush3.bf16.msra.mxu1 %v2020_v5  ;;  %1904 = vmatprep.subr.bf16.mxu0 %v2127_v13  ;;  %v1019_v5 = vld [vmem:[#allocation4 + $0xa0] sm:$0xff] }
  0x67   :  { %1924 = vmatprep.subr.bf16.mxu1 %v2127_v13  ;;  %v1751_v6 = vcombine.high %v1015_v4, %v1019_v5 }
  0x68   :  { %725 = vmatmul.mubr.bf16.vlgmr.msra.gmra.mrb[4].mxu0 %v1648_v7  ;;  %v1750_v7 = vcombine.low %v1015_v4, %v1019_v5 }
  0x69   :  { %765 = vmatmul.mubr.bf16.vlgmr.msra.gmra.mrb[4].mxu1 %v1650_v10  ;;  %1905 = vmatpush3.bf16.msra.mxu0 %v2025_v12  ;;  %v1759_v10 = vcombine.high %v1023_v8, %v1027_v9  ;;  %v1031_v12 = vld [vmem:[#allocation4 + $0x100] sm:$0xff] }
  0x6a   :  { %1906 = vmatprep.subr.bf16.mxu0 %v2127_v13  ;;  %1920 = vmatprep.mubr.msk.bf16.mxu0 %vm2128_vm0, %v2127_v13  ;;  %v1725_v8 = vld [vmem:[%s2312_s6] ss:$0 sm:$0xff] }
  0x6b   :  { %1940 = vmatprep.mubr.msk.bf16.mxu1 %vm2128_vm0, %v2127_v13  ;;  %1925 = vmatpush3.bf16.msra.mxu1 %v2033_v21  ;;  %v1051_v21 = vld [vmem:[#allocation4 + $0x1a0] sm:$0xff] }
  0x6c   :  { %1926 = vmatprep.subr.bf16.mxu1 %v2127_v13 }
  0x6d   :  { %1907 = vmatpush3.bf16.msra.mxu0 %v2026_v14 }
  0x6e   :  { %1908 = vmatprep.subr.bf16.mxu0 %v2127_v13 }
  0x6f   :  { %1927 = vmatpush3.bf16.msra.mxu1 %v2034_v22 }
  0x70   :  { %1928 = vmatprep.subr.bf16.mxu1 %v2127_v13 }
  0x71   :  { %1909 = vmatpush3.bf16.msra.mxu0 %v2027_v15 }
  0x72   :  { %1910 = vmatprep.subr.bf16.mxu0 %v2127_v13 }
  0x73   :  { %1929 = vmatpush3.bf16.msra.mxu1 %v2035_v23 }
  0x74   :  { %1930 = vmatprep.subr.bf16.mxu1 %v2127_v13 }
  0x75   :  { %1911 = vmatpush3.bf16.msra.mxu0 %v2028_v16  ;;  %v1039_v16 = vld [vmem:[#allocation4 + $0x140] sm:$0xff] }
  0x76   :  { %1912 = vmatprep.subr.bf16.mxu0 %v2127_v13 }
  0x77   :  { %1931 = vmatpush3.bf16.msra.mxu1 %v2036_v24  ;;  %v1716_v24 = vld [vmem:[%s2310_s4] ss:$0 sm:$0xff] }
  0x78   :  { %1932 = vmatprep.subr.bf16.mxu1 %v2127_v13 }
  0x79   :  { %1913 = vmatpush3.bf16.msra.mxu0 %v2029_v17  ;;  %v1043_v17 = vld [vmem:[#allocation4 + $0x160] sm:$0xff] }
  0x7a   :  { %1914 = vmatprep.subr.bf16.mxu0 %v2127_v13 }
  0x7b   :  { %1933 = vmatpush3.bf16.msra.mxu1 %v2037_v25 }
  0x7c   :  { %1934 = vmatprep.subr.bf16.mxu1 %v2127_v13 }
  0x7d   :  { %1915 = vmatpush3.bf16.msra.mxu0 %v2030_v18  ;;  %v1775_v18 = vcombine.high %v1039_v16, %v1043_v17 }
  0x7e   :  { %1916 = vmatprep.subr.bf16.mxu0 %v2127_v13 }
  0x7f   :  { %1935 = vmatpush3.bf16.msra.mxu1 %v2038_v26  ;;  %v1008_v26 = vld [vmem:[#allocation4 + $0x48] sm:$0xff] }
  0x80   :  { %1936 = vmatprep.subr.bf16.mxu1 %v2127_v13 }
  0x81   :  { %1917 = vmatpush3.bf16.msra.mxu0 %v2031_v19  ;;  %v1774_v19 = vcombine.low %v1039_v16, %v1043_v17  ;;  %v1014_v16 = vld [vmem:[#allocation4 + $0x78] sm:$0xff] }
  0x82   :  { %1918 = vmatprep.subr.bf16.mxu0 %v2127_v13 }
  0x83   :  { %1937 = vmatpush3.bf16.msra.mxu1 %v2039_v27  ;;  %v1012_v27 = vld [vmem:[#allocation4 + $0x68] sm:$0xff] }
  0x84   :  { %1938 = vmatprep.subr.bf16.mxu1 %v2127_v13  ;;  %v1035_v13 = vld [vmem:[#allocation4 + $0x120] sm:$0xff] }
  0x85   :  { %1919 = vmatpush3.bf16.msra.mxu0 %v2032_v20  ;;  %v1767_v14 = vcombine.high %v1031_v12, %v1035_v13  ;;  %v1766_v15 = vcombine.low %v1031_v12, %v1035_v13  ;;  %v1047_v20 = vld [vmem:[#allocation4 + $0x180] sm:$0xff]  ;;  %v1009_v12 = vld [vmem:[#allocation4 + $0x50] sm:$0xff] }
  0x86   :  { %1425 = vmatprep.subr.bf16.mxu0 %v1735_v60  ;;  %v1783_v22 = vcombine.high %v1047_v20, %v1051_v21  ;;  %v1782_v23 = vcombine.low %v1047_v20, %v1051_v21 }
  0x87   :  { %1939 = vmatpush3.bf16.msra.mxu1 %v2040_v55  ;;  %v1055_v55 = vld [vmem:[#allocation4 + $0x1c0] sm:$0xff] }
  0x88   :  { %1466 = vmatprep.subr.bf16.mxu1 %v1737_v1  ;;  %v1791_v58 = vcombine.high %v1055_v55, %v1059_v56  ;;  %v1790_v60 = vcombine.low %v1055_v55, %v1059_v56  ;;  %v1002_v1 = vld [vmem:[#allocation4 + $0x18] sm:$0xff]  ;;  %v1053_v55 = vld [vmem:[#allocation4 + $0x1b0] sm:$0xff] }
  0x89   :  { %v1050_v56 = vld [vmem:[#allocation4 + $0x198] sm:$0xff] }
 0x11b   :  { %v1814_v28 = vpop.f32.mrb[0].mxu0 }
 0x11c   :  { %v1836_v29 = vpop.f32.mrb[0].mxu1  ;;  %v1815_v31 = vpop.f32.mrb[1].mxu0 }
 0x11d   :  { %v1837_v32 = vpop.f32.mrb[1].mxu1  ;;  %v1816_v33 = vadd.f32 %v1815_v31, %v1814_v28  ;;  %v1817_v35 = vpop.f32.mrb[2].mxu0 }
 0x11e   :  { %v1838_v34 = vadd.f32 %v1837_v32, %v1836_v29  ;;  %v1839_v36 = vpop.f32.mrb[2].mxu1  ;;  %v1818_v37 = vpop.f32.mrb[3].mxu0  ;;  %v1020_v35 = vld [vmem:[#allocation4 + $0xa8] sm:$0xff] }
 0x11f   :  { %v1840_v38 = vpop.f32.mrb[3].mxu1  ;;  %v647_v39 = vadd.f32 %v1816_v33, %v1643_v30  ;;  %v1745_v33 = vcombine.high %v1008_v26, %v1012_v27  ;;  %v1744_v36 = vcombine.low %v1008_v26, %v1012_v27 }
 0x120   :  { %v1024_v38 = vld [vmem:[#allocation4 + $0xc8] sm:$0xff] }
 0x121   :  { %v687_v40 = vadd.f32 %v1838_v34, %v647_v39  ;;  %v1016_v34 = vld [vmem:[#allocation4 + $0x88] sm:$0xff] }
 0x122   :  { %v1753_v37 = vcombine.high %v1016_v34, %v1020_v35  ;;  %v1028_v39 = vld [vmem:[#allocation4 + $0xe8] sm:$0xff] }
 0x13b   :  { %v1858_v41 = vpop.f32.mrb[4].mxu0 }
 0x13c   :  { %v1880_v42 = vpop.f32.mrb[4].mxu1  ;;  %v1859_v43 = vpop.f32.mrb[5].mxu0 }
 0x13d   :  { %v1881_v44 = vpop.f32.mrb[5].mxu1  ;;  %v1860_v45 = vadd.f32 %v1859_v43, %v1858_v41  ;;  %v1861_v47 = vpop.f32.mrb[6].mxu0  ;;  %v1761_v41 = vcombine.high %v1024_v38, %v1028_v39  ;;  %v1036_v43 = vld [vmem:[#allocation4 + $0x128] sm:$0xff] }
 0x13e   :  { %v1882_v46 = vadd.f32 %v1881_v44, %v1880_v42  ;;  %v1883_v48 = vpop.f32.mrb[6].mxu1  ;;  %v1862_v49 = vpop.f32.mrb[7].mxu0  ;;  %v1032_v42 = vld [vmem:[#allocation4 + $0x108] sm:$0xff]  ;;  %v1760_v44 = vcombine.low %v1024_v38, %v1028_v39  ;;  %v1033_v38 = vld [vmem:[#allocation4 + $0x110] sm:$0xff] }
 0x13f   :  { %v1884_v50 = vpop.f32.mrb[7].mxu1  ;;  %v727_v51 = vadd.f32 %v1860_v45, %v687_v40  ;;  %v1752_v40 = vcombine.low %v1016_v34, %v1020_v35  ;;  %v1769_v45 = vcombine.high %v1032_v42, %v1036_v43  ;;  %v1044_v47 = vld [vmem:[#allocation4 + $0x168] sm:$0xff]  ;;  %v1768_v48 = vcombine.low %v1032_v42, %v1036_v43  ;;  %v1037_v39 = vld [vmem:[#allocation4 + $0x130] sm:$0xff] }
 0x140   :  { %v1048_v50 = vld [vmem:[#allocation4 + $0x188] sm:$0xff] }
 0x141   :  { %v767_v52 = vadd.f32 %v1882_v46, %v727_v51  ;;  %v1040_v46 = vld [vmem:[#allocation4 + $0x148] sm:$0xff] }
 0x142   :  { %v1777_v49 = vcombine.high %v1040_v46, %v1044_v47  ;;  %v1052_v51 = vld [vmem:[#allocation4 + $0x1a8] sm:$0xff] }
 0x143   :  { %v772_v53 = vmax.f32 %v767_v52, 0.0  ;;  %v1776_v52 = vcombine.low %v1040_v46, %v1044_v47  ;;  %v1041_v46 = vld [vmem:[#allocation4 + $0x150] sm:$0xff] }
 0x144   :  { %v1045_v47 = vld [vmem:[#allocation4 + $0x170] sm:$0xff] }
 0x145   :  { %v773_v54 = vpack.c.bf16 %v772_v53, %v772_v53  ;;  %v1785_v53 = vcombine.high %v1048_v50, %v1052_v51 }
 0x147   :  { %1921 = vmatmul.mubr.bf16.vlgmr.msra.gmra.mrb[8].mxu0 %v773_v54  ;;  %v1784_v54 = vcombine.low %v1048_v50, %v1052_v51  ;;  %v1770_v50 = vcombine.low %v1033_v38, %v1037_v39 }
 0x148   :  { %1426 = vmatpush1.bf16.msra.mxu0 %v1734_v59  ;;  %v1060_v59 = vld [vmem:[#allocation4 + $0x1e8] sm:$0xff] }
 0x149   :  { %1427 = vmatprep.subr.bf16.mxu0 %v1743_v2  ;;  %v1792_v61 = vcombine.low %v1056_v57, %v1060_v59  ;;  %v1793_v62 = vcombine.high %v1056_v57, %v1060_v59  ;;  %v1054_v57 = vld [vmem:[#allocation4 + $0x1b8] sm:$0xff] }
 0x14c   :  { %1428 = vmatpush1.bf16.msra.mxu0 %v1742_v3  ;;  %v1006_v3 = vld [vmem:[#allocation4 + $0x38] sm:$0xff] }
 0x14d   :  { %1429 = vmatprep.subr.bf16.mxu0 %v1751_v6  ;;  %v1740_v5 = vcombine.low %v1002_v1, %v1006_v3  ;;  %v1741_v6 = vcombine.high %v1002_v1, %v1006_v3  ;;  %v1062_v1 = vld [vmem:[#allocation4 + $0x1f8] sm:$0xff]  ;;  %v1788_v3 = vcombine.low %v1050_v56, %v1054_v57 }
 0x150   :  { %1430 = vmatpush1.bf16.msra.mxu0 %v1750_v7  ;;  %v2129_v7 = vmov 0  }
 0x151   :  { %1431 = vmatprep.subr.bf16.mxu0 %v1759_v10  ;;  %1457 = vmatprep.mubr.bf16.mxu0 %v2129_v7 }
 0x154   :  { %1432 = vmatpush1.bf16.msra.mxu0 %v1758_v11 }
 0x155   :  { %1433 = vmatprep.subr.bf16.mxu0 %v1767_v14  ;;  %v1013_v14 = vld [vmem:[#allocation4 + $0x70] sm:$0xff] }
 0x156   :  { %v1747_v20 = vcombine.high %v1009_v12, %v1013_v14  ;;  %v1746_v26 = vcombine.low %v1009_v12, %v1013_v14  ;;  %v1063_v12 = vld [vmem:[%s2314_s8] sm:$0xff] }
 0x158   :  { %1434 = vmatpush1.bf16.msra.mxu0 %v1766_v15  ;;  %v1010_v15 = vld [vmem:[#allocation4 + $0x58] sm:$0xff] }
 0x159   :  { %1435 = vmatprep.subr.bf16.mxu0 %v1775_v18  ;;  %v1749_v21 = vcombine.high %v1010_v15, %v1014_v16  ;;  %v1748_v27 = vcombine.low %v1010_v15, %v1014_v16 }
 0x15c   :  { %1436 = vmatpush1.bf16.msra.mxu0 %v1774_v19 }
 0x15d   :  { %1437 = vmatprep.subr.bf16.mxu0 %v1783_v22  ;;  %v1017_v22 = vld [vmem:[#allocation4 + $0x90] sm:$0xff] }
 0x160   :  { %1438 = vmatpush1.bf16.msra.mxu0 %v1782_v23  ;;  %v1021_v23 = vld [vmem:[#allocation4 + $0xb0] sm:$0xff] }
 0x161   :  { %1439 = vmatprep.subr.bf16.mxu0 %v1791_v58  ;;  %v1754_v34 = vcombine.low %v1017_v22, %v1021_v23  ;;  %v1778_v58 = vcombine.low %v1041_v46, %v1045_v47 }
 0x164   :  { %1440 = vmatpush1.bf16.msra.mxu0 %v1790_v60 }
 0x21a   :  { %v879_v25 = vpop.f32.mrb[8].mxu0 }
 0x21b   :  { %v880_v28 = vadd.f32 %v1716_v24, %v879_v25  ;;  %v1922_v29 = vpop.f32.mrb[9].mxu0  ;;  %v1018_v24 = vld [vmem:[#allocation4 + $0x98] sm:$0xff] }
 0x21c   :  { %v882_v30 = vpop.f32.mrb[10].mxu0  ;;  %v1022_v25 = vld [vmem:[#allocation4 + $0xb8] sm:$0xff] }
 0x21d   :  { %v885_v31 = vpack.c.bf16 %v880_v28, %v880_v28  ;;  %v1923_v32 = vpop.f32.mrb[11].mxu0  ;;  %v1755_v28 = vcombine.high %v1017_v22, %v1021_v23  ;;  %v1757_v29 = vcombine.high %v1018_v24, %v1022_v25  ;;  %v1025_v30 = vld [vmem:[#allocation4 + $0xd0] sm:$0xff]  ;;  %v1756_v35 = vcombine.low %v1018_v24, %v1022_v25 }
 0x21e   :  { %v1026_v32 = vld [vmem:[#allocation4 + $0xd8] sm:$0xff] }
 0x21f   :  { %1941 = vmatmul.mubr.bf16.vlgmr.msra.gmra.mrb[8].mxu1 %v885_v31  ;;  %v1029_v31 = vld [vmem:[#allocation4 + $0xf0] sm:$0xff] }
 0x220   :  { %1467 = vmatpush1.bf16.msra.mxu1 %v1736_v0  ;;  %v1005_v0 = vld [vmem:[#allocation4 + $0x30] sm:$0xff]  ;;  %1498 = vmatprep.mubr.bf16.mxu1 %v2129_v7  ;;  %v1762_v42 = vcombine.low %v1025_v30, %v1029_v31 }
 0x221   :  { %1468 = vmatprep.subr.bf16.mxu1 %v1745_v33  ;;  %v1739_v2 = vcombine.high %v1001_v63, %v1005_v0  ;;  %v1738_v4 = vcombine.low %v1001_v63, %v1005_v0  ;;  %v1030_v33 = vld [vmem:[#allocation4 + $0xf8] sm:$0xff]  ;;  %v1061_v63 = vld [vmem:[#allocation4 + $0x1f0] sm:$0xff] }
 0x222   :  { %v1764_v43 = vcombine.low %v1026_v32, %v1030_v33  ;;  %v1058_v0 = vld [vmem:[#allocation4 + $0x1d8] sm:$0xff] }
 0x223   :  { %1507 = vmatprep.subr.bf16.mxu0 %v1739_v2 }
 0x224   :  { %1469 = vmatpush1.bf16.msra.mxu1 %v1744_v36  ;;  %v1763_v36 = vcombine.high %v1025_v30, %v1029_v31 }
 0x225   :  { %1470 = vmatprep.subr.bf16.mxu1 %v1753_v37  ;;  %v1765_v37 = vcombine.high %v1026_v32, %v1030_v33 }
 0x228   :  { %1471 = vmatpush1.bf16.msra.mxu1 %v1752_v40  ;;  %v1034_v40 = vld [vmem:[#allocation4 + $0x118] sm:$0xff] }
 0x229   :  { %1472 = vmatprep.subr.bf16.mxu1 %v1761_v41  ;;  %v1038_v41 = vld [vmem:[#allocation4 + $0x138] sm:$0xff] }
 0x22a   :  { %v1772_v51 = vcombine.low %v1034_v40, %v1038_v41 }
 0x22c   :  { %1473 = vmatpush1.bf16.msra.mxu1 %v1760_v44  ;;  %v1771_v44 = vcombine.high %v1033_v38, %v1037_v39 }
 0x22d   :  { %1474 = vmatprep.subr.bf16.mxu1 %v1769_v45  ;;  %v1773_v45 = vcombine.high %v1034_v40, %v1038_v41 }
 0x230   :  { %1475 = vmatpush1.bf16.msra.mxu1 %v1768_v48  ;;  %v1042_v48 = vld [vmem:[#allocation4 + $0x158] sm:$0xff] }
 0x231   :  { %1476 = vmatprep.subr.bf16.mxu1 %v1777_v49  ;;  %v1046_v49 = vld [vmem:[#allocation4 + $0x178] sm:$0xff] }
 0x232   :  { %v1780_v59 = vcombine.low %v1042_v48, %v1046_v49 }
 0x234   :  { %1477 = vmatpush1.bf16.msra.mxu1 %v1776_v52  ;;  %v1779_v52 = vcombine.high %v1041_v46, %v1045_v47 }
 0x235   :  { %1478 = vmatprep.subr.bf16.mxu1 %v1785_v53  ;;  %v1781_v53 = vcombine.high %v1042_v48, %v1046_v49 }
 0x238   :  { %1479 = vmatpush1.bf16.msra.mxu1 %v1784_v54  ;;  %v1049_v54 = vld [vmem:[#allocation4 + $0x190] sm:$0xff] }
 0x239   :  { %1480 = vmatprep.subr.bf16.mxu1 %v1793_v62  ;;  %v1787_v60 = vcombine.high %v1049_v54, %v1053_v55  ;;  %v1057_v62 = vld [vmem:[#allocation4 + $0x1d0] sm:$0xff]  ;;  %v1786_v2 = vcombine.low %v1049_v54, %v1053_v55 }
 0x23c   :  { %1481 = vmatpush1.bf16.msra.mxu1 %v1792_v61  ;;  %v1789_v61 = vcombine.high %v1050_v56, %v1054_v57 }
 0x23d   :  { %1548 = vmatprep.subr.bf16.mxu1 %v1741_v6  ;;  %v1794_v6 = vcombine.low %v1057_v62, %v1061_v63 }
 0x2f2   :  { %v991_v9 = vpop.f32.mrb[8].mxu1 }
 0x2f3   :  { %v992_v10 = vadd.f32 %v1725_v8, %v991_v9  ;;  %v1942_v11 = vpop.f32.mrb[9].mxu1  ;;  %v1065_v8 = vlaneseq }
 0x2f4   :  { %v994_v13 = vpop.f32.mrb[10].mxu1 }
 0x2f5   :  { %v997_v17 = vmax.f32 %v992_v10, 0.0  ;;  %v1943_v18 = vpop.f32.mrb[11].mxu1  ;;  %v1066_v9 = vshrl.u32 %v1065_v8, 7 }
 0x2f7   :  { %v2273_v19 = vpack.c.bf16 %v997_v17, %v997_v17  ;;  %v1067_v10 = vsub.s32 0, %v1066_v9  ;;  %v1075_v11 = vsub.s32 2, %v1066_v9  ;;  %v1071_v13 = vsub.s32 1, %v1066_v9 }
 0x2f8   :  { %v1079_v14 = vsub.s32 3, %v1066_v9  ;;  %v1083_v47 = vsub.s32 4, %v1066_v9  ;;  %v1091_v48 = vsub.s32 6, %v1066_v9  ;;  %v1087_v49 = vsub.s32 5, %v1066_v9 }
 0x2f9   :  { %1458 = vmatmul.mubr.bf16.vlgmr.msra.gmra.mrb[12].mxu0 %v2273_v19  ;;  %1499 = vmatmul.mubr.bf16.vlgmr.msra.gmra.mrb[12].mxu1 %v2273_v19  ;;  %v1068_v15 = vrot.slane %v1063_v12, %v1067_v10  ;;  %v1076_v16 = vrot.slane %v1063_v12, %v1075_v11  ;;  %v1072_v17 = vrot.slane %v1063_v12, %v1071_v13 }
 0x2fa   :  { %1508 = vmatpush1.bf16.msra.mxu0 %v1738_v4  ;;  %1549 = vmatpush1.bf16.msra.mxu1 %v1740_v5  ;;  %v1795_v4 = vcombine.high %v1057_v62, %v1061_v63  ;;  %v1797_v5 = vcombine.high %v1058_v0, %v1062_v1  ;;  %v1080_v18 = vrot.slane %v1063_v12, %v1079_v14 }
 0x2fb   :  { %1509 = vmatprep.subr.bf16.mxu0 %v1747_v20  ;;  %1550 = vmatprep.subr.bf16.mxu1 %v1749_v21  ;;  %v1088_v54 = vrot.slane %v1063_v12, %v1087_v49 }
 0x2fc   :  { %1539 = vmatprep.mubr.bf16.mxu0 %v2129_v7  ;;  %1580 = vmatprep.mubr.bf16.mxu1 %v2129_v7  ;;  %v1796_v7 = vcombine.low %v1058_v0, %v1062_v1 }
 0x2fe   :  { %1510 = vmatpush1.bf16.msra.mxu0 %v1746_v26  ;;  %1551 = vmatpush1.bf16.msra.mxu1 %v1748_v27 }
 0x2ff   :  { %1511 = vmatprep.subr.bf16.mxu0 %v1755_v28  ;;  %1552 = vmatprep.subr.bf16.mxu1 %v1757_v29 }
 0x302   :  { %1512 = vmatpush1.bf16.msra.mxu0 %v1754_v34  ;;  %1553 = vmatpush1.bf16.msra.mxu1 %v1756_v35 }
 0x303   :  { %1513 = vmatprep.subr.bf16.mxu0 %v1763_v36  ;;  %1554 = vmatprep.subr.bf16.mxu1 %v1765_v37 }
 0x306   :  { %1514 = vmatpush1.bf16.msra.mxu0 %v1762_v42  ;;  %1555 = vmatpush1.bf16.msra.mxu1 %v1764_v43 }
 0x307   :  { %1515 = vmatprep.subr.bf16.mxu0 %v1771_v44  ;;  %1556 = vmatprep.subr.bf16.mxu1 %v1773_v45 }
 0x30a   :  { %1516 = vmatpush1.bf16.msra.mxu0 %v1770_v50  ;;  %1557 = vmatpush1.bf16.msra.mxu1 %v1772_v51  ;;  %v1095_v50 = vsub.s32 7, %v1066_v9  ;;  %v1084_v51 = vrot.slane %v1063_v12, %v1083_v47 }
 0x30b   :  { %1517 = vmatprep.subr.bf16.mxu0 %v1779_v52  ;;  %1558 = vmatprep.subr.bf16.mxu1 %v1781_v53  ;;  %v1092_v52 = vrot.slane %v1063_v12, %v1091_v48 }
 0x30c   :  { %v1096_v55 = vrot.slane %v1063_v12, %v1095_v50 }
 0x30e   :  { %1518 = vmatpush1.bf16.msra.mxu0 %v1778_v58  ;;  %1559 = vmatpush1.bf16.msra.mxu1 %v1780_v59 }
 0x30f   :  { %1519 = vmatprep.subr.bf16.mxu0 %v1787_v60  ;;  %1560 = vmatprep.subr.bf16.mxu1 %v1789_v61 }
 0x312   :  { %1520 = vmatpush1.bf16.msra.mxu0 %v1786_v2  ;;  %1561 = vmatpush1.bf16.msra.mxu1 %v1788_v3 }
 0x313   :  { %1521 = vmatprep.subr.bf16.mxu0 %v1795_v4  ;;  %1562 = vmatprep.subr.bf16.mxu1 %v1797_v5 }
 0x316   :  { %1522 = vmatpush1.bf16.msra.mxu0 %v1794_v6  ;;  %1563 = vmatpush1.bf16.msra.mxu1 %v1796_v7 }
 0x319   :  { %1540 = vmatmul.mubr.bf16.vlgmr.msra.gmra.mrb[16].mxu0 %v2273_v19  ;;  %1581 = vmatmul.mubr.bf16.vlgmr.msra.gmra.mrb[16].mxu1 %v2273_v19 }
 0x3cc   :  { %v1459_v20 = vpop.f32.mrb[12].mxu0  ;;  %v1500_v21 = vpop.f32.mrb[12].mxu1 }
 0x3cd   :  { %v1460_v22 = vadd.f32 %v1459_v20, %v1068_v15  ;;  %v1501_v23 = vadd.f32 %v1500_v21, %v1076_v16  ;;  %v1461_v24 = vpop.f32.mrb[13].mxu0  ;;  %v1502_v19 = vpop.f32.mrb[13].mxu1 }
 0x3ce   :  { %v1462_v25 = vadd.f32 %v1461_v24, %v1072_v17  ;;  %v1503_v26 = vadd.f32 %v1502_v19, %v1080_v18  ;;  %v1463_v27 = vpop.f32.mrb[14].mxu0  ;;  %v1504_v28 = vpop.f32.mrb[14].mxu1 }
 0x3cf   :  { %v1589_v29 = vsub.f32 0.0, %v1460_v22  ;;  %v1591_v30 = vsub.f32 0.0, %v1501_v23  ;;  %v1464_v31 = vpop.f32.mrb[15].mxu0  ;;  %v1505_v32 = vpop.f32.mrb[15].mxu1 }
 0x3d0   :  { %v1590_v33 = vsub.f32 0.0, %v1462_v25  ;;  %v1592_v34 = vsub.f32 0.0, %v1503_v26 }
 0x3d1   :  { %v1597_v35 = vmul.f32 1.442695, %v1589_v29  ;;  %v1601_v36 = vmul.f32 1.442695, %v1591_v30 }
 0x3d2   :  { %v1599_v37 = vmul.f32 1.442695, %v1590_v33  ;;  %v1603_v38 = vmul.f32 1.442695, %v1592_v34 }
 0x3d3   :  { %2041 = vpow2.f32 %v1597_v35 }
 0x3d4   :  { %2043 = vpow2.f32 %v1601_v36 }
 0x3d5   :  { %2045 = vpow2.f32 %v1599_v37 }
 0x3d6   :  { %2047 = vpow2.f32 %v1603_v38 }
 0x3dd   :  { %v2042_v39 = vpop.eup %2041 }
 0x3de   :  { %v2044_v40 = vpop.eup %2043  ;;  %v1613_v41 = vadd.f32 1.0, %v2042_v39 }
 0x3df   :  { %v2046_v42 = vpop.eup %2045  ;;  %v1615_v43 = vadd.f32 1.0, %v2044_v40 }
 0x3e0   :  { %v2048_v44 = vpop.eup %2047  ;;  %2049 = vrcp.f32 %v1613_v41  ;;  %v1614_v45 = vadd.f32 1.0, %v2046_v42 }
 0x3e1   :  { %2051 = vrcp.f32 %v1615_v43  ;;  %v1616_v46 = vadd.f32 1.0, %v2048_v44 }
 0x3e2   :  { %2053 = vrcp.f32 %v1614_v45 }
 0x3e3   :  { %2055 = vrcp.f32 %v1616_v46 }
 0x3ea   :  { %v2050_v53 = vpop.eup %2049 }
 0x3eb   :  { %v2052_v56 = vpop.eup %2051  ;;  %1629 = vst [vmem:[%s2315_s9] sm:$0xff] %v2050_v53 }
 0x3ec   :  { %v2054_v57 = vpop.eup %2053  ;;  %1631 = vst [vmem:[%s2315_s9 + $0x10] sm:$0xff] %v2052_v56  ;;  %v1541_v58 = vpop.f32.mrb[16].mxu0 }
 0x3ed   :  { %v1582_v59 = vpop.f32.mrb[16].mxu1  ;;  %v2056_v60 = vpop.eup %2055  ;;  %1630 = vst [vmem:[%s2315_s9 + $0x8] sm:$0xff] %v2054_v57  ;;  %v1542_v61 = vadd.f32 %v1541_v58, %v1084_v51 }
 0x3ee   :  { %v1583_v62 = vadd.f32 %v1582_v59, %v1092_v52  ;;  %v1543_v63 = vpop.f32.mrb[17].mxu0  ;;  %v1584_v0 = vpop.f32.mrb[17].mxu1  ;;  %1632 = vst [vmem:[%s2315_s9 + $0x18] sm:$0xff] %v2056_v60 }
 0x3ef   :  { %v1544_v1 = vadd.f32 %v1543_v63, %v1088_v54  ;;  %v1585_v2 = vadd.f32 %v1584_v0, %v1096_v55  ;;  %v1545_v3 = vpop.f32.mrb[18].mxu0  ;;  %v1586_v4 = vpop.f32.mrb[18].mxu1  ;;  %v1593_v5 = vsub.f32 0.0, %v1542_v61 }
 0x3f0   :  { %v1595_v6 = vsub.f32 0.0, %v1583_v62  ;;  %v1546_v7 = vpop.f32.mrb[19].mxu0  ;;  %v1587_v8 = vpop.f32.mrb[19].mxu1 }
 0x3f1   :  { %v1594_v9 = vsub.f32 0.0, %v1544_v1  ;;  %v1596_v10 = vsub.f32 0.0, %v1585_v2  ;;  %v1605_v11 = vmul.f32 1.442695, %v1593_v5 }
 0x3f2   :  { %v1609_v12 = vmul.f32 1.442695, %v1595_v6 }
 0x3f3   :  { %v1607_v13 = vmul.f32 1.442695, %v1594_v9  ;;  %v1611_v14 = vmul.f32 1.442695, %v1596_v10  ;;  %2057 = vpow2.f32 %v1605_v11 }
 0x3f4   :  { %2059 = vpow2.f32 %v1609_v12 }
 0x3f5   :  { %2061 = vpow2.f32 %v1607_v13 }
 0x3f6   :  { %2063 = vpow2.f32 %v1611_v14 }
 0x3fd   :  { %v2058_v15 = vpop.eup %2057 }
 0x3fe   :  { %v2060_v16 = vpop.eup %2059  ;;  %v1617_v17 = vadd.f32 1.0, %v2058_v15 }
 0x3ff   :  { %v2062_v18 = vpop.eup %2061  ;;  %v1619_v20 = vadd.f32 1.0, %v2060_v16 }
 0x400   :  { %v2064_v21 = vpop.eup %2063  ;;  %2065 = vrcp.f32 %v1617_v17  ;;  %v1618_v22 = vadd.f32 1.0, %v2062_v18 }
 0x401   :  { %2067 = vrcp.f32 %v1619_v20  ;;  %v1620_v23 = vadd.f32 1.0, %v2064_v21 }
 0x402   :  { %2069 = vrcp.f32 %v1618_v22 }
 0x403   :  { %2071 = vrcp.f32 %v1620_v23 }
 0x40a   :  { %v2066_v24 = vpop.eup %2065 }
 0x40b   :  { %v2068_v19 = vpop.eup %2067  ;;  %1633 = vst [vmem:[%s2315_s9 + $0x20] sm:$0xff] %v2066_v24 }
 0x40c   :  { %v2070_v25 = vpop.eup %2069  ;;  %1635 = vst [vmem:[%s2315_s9 + $0x30] sm:$0xff] %v2068_v19 }
 0x40d   :  { %v2072_v26 = vpop.eup %2071  ;;  %1634 = vst [vmem:[%s2315_s9 + $0x28] sm:$0xff] %v2070_v25 }
 0x40e   :  { %1636 = vst [vmem:[%s2315_s9 + $0x38] sm:$0xff] %v2072_v26 }
 0x40f   :  { %1641 = vsyncpa [#allocation3], 1 }
 0x410   :  { %1642 = vsyncpa [#allocation5], 1 }

</bundles_post_ra>
